<compile_context>
chip_gen: v5e
topology: v5e:2x2
jax: 0.10.0
libtpu: 0.0.40
codegen_flags: <defaults>
</compile_context>

<pallas_src>
import functools

import jax
import jax.numpy as jnp
from jax import lax
from jax.experimental import pallas as pl
from jax.experimental.pallas import tpu as pltpu

WINDOW = 15                      # 15x15 NMS window
RADIUS = WINDOW // 2             # 7
HALO = 8                         # halo rows per side (>= RADIUS, sublane-aligned)
SCORE_THRESHOLD = 0.99
NEG = -1e30
VMEM_LIMIT = 32 * 1024 * 1024    # explicit scoped-VMEM limit (v7x-safe)
DEFAULT_STRIP = 128              # rows per NMS strip (multiple of 8)
NSEM = 8                         # rotating DMA semaphores for the descriptor gather


def nms_kernel(top_ref, mid_ref, bot_ref, prio_ref, *, strip, wp, n_strips):
    """15x15 NMS + threshold on one (strip + 2*HALO, wp) NEG-padded heatmap strip.

    Emits an int32 priority map: row-major flat index (y*wp + x) where a peak above the
    score threshold survives, else SENTINEL (= n_strips*strip*wp).  NEG pad lanes / rows
    always fail the threshold, so no lane/row masks are needed.
    """
    s = pl.program_id(1)
    sh = strip + 2 * HALO
    sent = n_strips * strip * wp

    # Assemble strip + halos; all pieces are sublane-aligned (multiples of 8 rows).
    x = jnp.concatenate([top_ref[0], mid_ref[0], bot_ref[0]], axis=0)   # (sh, wp)

    def wmax15(v, axis, size):
        # fwd8[i] = max(v[i .. i+7]); w15[i] = max(fwd8[i], fwd8[i-7]) = max(v[i-7 .. i+7]).
        # The >= 7-wide NEG halos on every border make roll wrap-around benign, so no
        # border selects / iotas are needed and the 15-window costs 4 rolls per axis.
        f = v
        for sft in (1, 2, 4):
            f = jnp.maximum(f, pltpu.roll(f, size - sft, axis))   # r[i] = f[(i+sft) % size]
        return jnp.maximum(f, pltpu.roll(f, RADIUS, axis))        # r[i] = f[(i-7) % size]

    m = wmax15(x, 1, wp)          # along W (lane axis, XLU)
    m = wmax15(m, 0, sh)          # along H (sublane axis, XLU)

    xc = x[HALO:HALO + strip]     # center rows only (sublane-aligned static slice)
    mc = m[HALO:HALO + strip]
    # TODO(synk): exact float ties are broken by max_pool2d(return_indices=True) in torch;
    # value-equality keeps both (never occurs for these inputs).
    keep = (xc == mc) & (xc > SCORE_THRESHOLD)

    r = lax.broadcasted_iota(jnp.int32, (strip, wp), 0) + s * strip
    c = lax.broadcasted_iota(jnp.int32, (strip, wp), 1)
    prio_ref[0] = jnp.where(keep, r * wp + c, sent)


def gather_desc_kernel(flat_ref, inp_ref, desc_ref, gbuf, sem, *, n_kp, nsem):
    """Gather + L2-normalize descriptors for one batch element.

    flat_ref: SMEM (B, N) int32 scalar-prefetch flat spatial indices (y*W + x)
    inp_ref:  ANY  (B, 129, H*W) f32 raw input (ch 0 = heatmap, ch 1..128 = features)
    desc_ref: VMEM (1, 128, N) f32 output block (channel-major; transposed in XLA)
    gbuf:     VMEM (128, N) f32 scratch, column n = descriptor of keypoint n
    sem:      DMA semaphores (nsem,), rotated
    """
    b = pl.program_id(0)

    def cp(n, slot):
        src = inp_ref.at[b, pl.ds(1, 128), pl.ds(flat_ref[b, n], 1)]    # (128, 1)
        return pltpu.make_async_copy(src, gbuf.at[:, pl.ds(n, 1)], sem.at[slot])

    # TODO(synk): for n_kp in the hundreds replace this static unroll with a pl.loop over
    # dynamic-offset DMAs (or a one-hot MXU gather over streamed feature tiles); at these
    # sizes the unroll is tiny and the rotating semaphore set keeps resources bounded.
    for n in range(n_kp):
        slot = n % nsem
        if n >= nsem:
            cp(n - nsem, slot).wait()        # free the slot before reuse
        cp(n, slot).start()
    for n in range(max(0, n_kp - nsem), n_kp):
        cp(n, n % nsem).wait()

    d = gbuf[...]                                      # (128, N)
    ss = jnp.sum(d * d, axis=0, keepdims=True)         # (1, N) sublane reduce (XLU)
    norm = jnp.maximum(jnp.sqrt(ss), 1e-12)            # F.normalize eps
    desc_ref[0] = d / norm


def disk_headers_forward(input_tensor, juncs_pred_hawp, num_keypoints):
    """input_tensor: (B, 129, H, W) f32 NCHW; juncs_pred_hawp: (B, M, 2) or (M, 2) float (x, y)."""
    B, C, H, W = input_tensor.shape
    assert C == 129
    if juncs_pred_hawp.ndim == 2:
        juncs_pred_hawp = juncs_pred_hawp[None]
    M = juncs_pred_hawp.shape[-2]
    K = num_keypoints
    N = M + K

    heatmap = input_tensor[:, 0]                       # (B, H, W)

    # ---- kernel 1: 15x15 NMS + threshold -> int32 priority map ----------------------
    STRIP = min(DEFAULT_STRIP, ((H + 7) // 8) * 8)     # rows per strip (multiple of 8)
    n_strips = -(-H // STRIP)
    HS = n_strips * STRIP
    Wp = ((W + RADIUS + 127) // 128) * 128             # >= 7 NEG lanes beyond W
    Hp = (n_strips + 2) * STRIP                        # STRIP NEG rows above & below
    SENT = HS * Wp

    hp_pad = jnp.pad(
        heatmap,
        ((0, 0), (STRIP, Hp - STRIP - H), (0, Wp - W)),
        constant_values=NEG)                           # (B, Hp, Wp), real rows at [STRIP, STRIP+H)

    hb = STRIP // HALO                                 # halo blocks (of 8 rows) per strip
    prio = pl.pallas_call(
        functools.partial(nms_kernel, strip=STRIP, wp=Wp, n_strips=n_strips),
        out_shape=jax.ShapeDtypeStruct((B, HS, Wp), jnp.int32),
        grid=(B, n_strips),
        in_specs=[
            # three auto-pipelined views of the SAME padded array: top halo / center / bottom halo
            pl.BlockSpec((1, HALO, Wp), lambda b, s: (b, (s + 1) * hb - 1, 0)),
            pl.BlockSpec((1, STRIP, Wp), lambda b, s: (b, s + 1, 0)),
            pl.BlockSpec((1, HALO, Wp), lambda b, s: (b, (s + 2) * hb, 0)),
        ],
        out_specs=pl.BlockSpec((1, STRIP, Wp), lambda b, s: (b, s, 0)),
        compiler_params=pltpu.CompilerParams(
            dimension_semantics=("parallel", "parallel"),
            vmem_limit_bytes=VMEM_LIMIT),
    )(hp_pad, hp_pad, hp_pad)

    # hierarchical top-k: K smallest flat indices per strip, then K over the strip winners.
    # Priority values ARE the flat indices, so no separate index bookkeeping is needed.
    kk = min(K, STRIP * Wp)
    cand = -lax.top_k(-prio.reshape(B, n_strips, STRIP * Wp), kk)[0]   # (B, n_strips, kk)
    idx = -lax.top_k(-cand.reshape(B, n_strips * kk), K)[0]            # (B, K) ascending

    # TODO(synk): if fewer than K peaks survive the threshold, sentinel picks land here;
    # coords are clamped so all gathers stay in-bounds, but those rows are meaningless
    # (torch would instead return fewer keypoints).
    ys_kp = jnp.minimum(idx // Wp, H - 1).astype(jnp.int32)
    xs_kp = jnp.minimum(idx % Wp, W - 1).astype(jnp.int32)
    kp_xy = jnp.stack([xs_kp, ys_kp], axis=-1)          # (B, K, 2) -> Keypoints.xys

    junc_int = juncs_pred_hawp.astype(jnp.int32)        # torch .type(torch.int) truncation
    keypoints_final = jnp.concatenate([junc_int, kp_xy], axis=-2)      # (B, N, 2)

    # detection scores (tiny): heat value at each kept peak / per-image max; junctions = 1.0
    kp_hw = ys_kp * W + xs_kp
    kp_vals = jnp.take_along_axis(heatmap.reshape(B, H * W), kp_hw, axis=1)   # (B, K)
    kp_max = jnp.max(kp_vals, axis=-1, keepdims=True)
    scores = jnp.concatenate(
        [jnp.ones((B, M), jnp.float32), kp_vals / kp_max], axis=-1)    # (B, N)

    # ---- kernel 2: per-keypoint descriptor DMA gather + L2 normalize -----------------
    gx = jnp.clip(jnp.concatenate([junc_int[..., 0], xs_kp], axis=-1), 0, W - 1)
    gy = jnp.clip(jnp.concatenate([junc_int[..., 1], ys_kp], axis=-1), 0, H - 1)
    flat = (gy * W + gx).astype(jnp.int32)               # (B, N) flat spatial indices

    inp_flat = input_tensor.reshape(B, C, H * W)          # free reshape; no NCHW->NHWC copy

    nsem = min(NSEM, N)
    desc_cm = pl.pallas_call(
        functools.partial(gather_desc_kernel, n_kp=N, nsem=nsem),
        out_shape=jax.ShapeDtypeStruct((B, 128, N), jnp.float32),
        grid_spec=pltpu.PrefetchScalarGridSpec(
            num_scalar_prefetch=1,
            grid=(B,),
            in_specs=[pl.BlockSpec(memory_space=pl.ANY)],
            out_specs=pl.BlockSpec((1, 128, N), lambda b, flat_ref: (b, 0, 0)),
            scratch_shapes=[pltpu.VMEM((128, N), jnp.float32),
                            pltpu.SemaphoreType.DMA((nsem,))]),
        compiler_params=pltpu.CompilerParams(
            dimension_semantics=("parallel",),
            vmem_limit_bytes=VMEM_LIMIT),
    )(flat, inp_flat)
    desc = jnp.transpose(desc_cm, (0, 2, 1))              # (B, N, 128), tiny XLA transpose

    return keypoints_final, desc, scores


if __name__ == "__main__":
    key = jax.random.PRNGKey(0)
    k1, k2 = jax.random.split(key)

    B, Cin, H, W = 2, 129, 16, 16
    M_JUNCS = 4

    # base input: heatmap channel < threshold, feature channels random
    inp = jax.random.uniform(k1, (B, Cin, H, W), jnp.float32) * 0.5

    # plant exactly 4 well-separated heatmap peaks (> 0.99, spacing > window//2)
    peak_yx = [(3, 3), (3, 12), (12, 3), (12, 12)]
    peak_vals = jnp.array([[1.2, 1.7, 1.05, 1.9],
                           [1.5, 1.1, 1.80, 1.3]], dtype=jnp.float32)
    heat0 = inp[:, 0]
    for j, (py, px) in enumerate(peak_yx):
        heat0 = heat0.at[:, py, px].set(peak_vals[:, j])
    inp = inp.at[:, 0].set(heat0)
    K_KP = len(peak_yx)

    # HAWP junction predictions (float (x, y) coords), cast to int in the forward
    juncs = jax.random.uniform(k2, (B, M_JUNCS, 2), jnp.float32) * (W - 1)

    kpts, desc, scores = disk_headers_forward(inp, juncs, K_KP)
    jax.block_until_ready((kpts, desc, scores))

    # ---- plain-JAX reference check ----
    fm = inp[:, 1:129]
    heat = inp[:, 0]
    ok = True
    for b in range(B):
        xs = kpts[b, :, 0]
        ys = kpts[b, :, 1]
        d_ref = fm[b][:, ys, xs].T                                       # (N, 128)
        d_ref = d_ref / jnp.maximum(
            jnp.linalg.norm(d_ref, axis=-1, keepdims=True), 1e-12)
        hv = heat[b, ys[M_JUNCS:], xs[M_JUNCS:]]
        s_ref = jnp.concatenate([jnp.ones((M_JUNCS,), jnp.float32), hv / hv.max()])
        ok &= bool(jnp.allclose(desc[b], d_ref, atol=1e-5))
        ok &= bool(jnp.allclose(scores[b], s_ref, atol=1e-5))
        # planted peaks must be recovered in row-major (y, x) order as (x, y)
        exp_xy = jnp.array([(px, py) for (py, px) in peak_yx], jnp.int32)
        ok &= bool(jnp.array_equal(kpts[b, M_JUNCS:], exp_xy))

    assert kpts.shape == (B, M_JUNCS + K_KP, 2)
    assert desc.shape == (B, M_JUNCS + K_KP, 128)
    assert scores.shape == (B, M_JUNCS + K_KP)
    assert ok
    print("KERNEL_OK")
</pallas_src>

<mosaic_0001>
module attributes {stable_mosaic.version = 11 : i64} {
  func.func @nms_kernel(%arg0: i32, %arg1: i32, %arg2: memref<1x8x128xf32, #tpu.memory_space<vmem>>, %arg3: memref<1x16x128xf32, #tpu.memory_space<vmem>>, %arg4: memref<1x8x128xf32, #tpu.memory_space<vmem>>, %arg5: memref<1x16x128xi32, #tpu.memory_space<vmem>>) attributes {dimension_semantics = [#tpu.dimension_semantics<parallel>, #tpu.dimension_semantics<parallel>], iteration_bounds = array<i64: 2, 1>, scalar_prefetch = 0 : i64, scratch_operands = 0 : i64, tpu.core_type = #tpu.core_type<tc>, window_params = [{transform_indices = @transform_0, window_bounds = array<i64: 1, 8, 128>}, {transform_indices = @transform_1, window_bounds = array<i64: 1, 16, 128>}, {transform_indices = @transform_2, window_bounds = array<i64: 1, 8, 128>}, {transform_indices = @transform_3, window_bounds = array<i64: 1, 16, 128>}]} {
    %c0 = arith.constant 0 : index
    %c0_0 = arith.constant 0 : index
    %c0_1 = arith.constant 0 : index
    %0 = vector.load %arg2[%c0, %c0_0, %c0_1] : memref<1x8x128xf32, #tpu.memory_space<vmem>>, vector<1x8x128xf32>
    %1 = vector.shape_cast %0 : vector<1x8x128xf32> to vector<8x128xf32>
    %c0_2 = arith.constant 0 : index
    %c0_3 = arith.constant 0 : index
    %c0_4 = arith.constant 0 : index
    %2 = vector.load %arg3[%c0_2, %c0_3, %c0_4] : memref<1x16x128xf32, #tpu.memory_space<vmem>>, vector<1x16x128xf32>
    %3 = vector.shape_cast %2 : vector<1x16x128xf32> to vector<16x128xf32>
    %c0_5 = arith.constant 0 : index
    %c0_6 = arith.constant 0 : index
    %c0_7 = arith.constant 0 : index
    %4 = vector.load %arg4[%c0_5, %c0_6, %c0_7] : memref<1x8x128xf32, #tpu.memory_space<vmem>>, vector<1x8x128xf32>
    %5 = vector.shape_cast %4 : vector<1x8x128xf32> to vector<8x128xf32>
    %6 = tpu.concatenate %1, %3, %5 in 0 : vector<8x128xf32>, vector<16x128xf32>, vector<8x128xf32> -> vector<32x128xf32>
    %c127_i32 = arith.constant 127 : i32
    %7 = tpu.dynamic_rotate %6 by %c127_i32 dim 1 : vector<32x128xf32>, i32 -> vector<32x128xf32>
    %8 = arith.maximumf %6, %7 : vector<32x128xf32>
    %c126_i32 = arith.constant 126 : i32
    %9 = tpu.dynamic_rotate %8 by %c126_i32 dim 1 : vector<32x128xf32>, i32 -> vector<32x128xf32>
    %10 = arith.maximumf %8, %9 : vector<32x128xf32>
    %c124_i32 = arith.constant 124 : i32
    %11 = tpu.dynamic_rotate %10 by %c124_i32 dim 1 : vector<32x128xf32>, i32 -> vector<32x128xf32>
    %12 = arith.maximumf %10, %11 : vector<32x128xf32>
    %c7_i32 = arith.constant 7 : i32
    %13 = tpu.dynamic_rotate %12 by %c7_i32 dim 1 : vector<32x128xf32>, i32 -> vector<32x128xf32>
    %14 = arith.maximumf %12, %13 : vector<32x128xf32>
    %c31_i32 = arith.constant 31 : i32
    %15 = tpu.dynamic_rotate %14 by %c31_i32 dim 0 : vector<32x128xf32>, i32 -> vector<32x128xf32>
    %16 = arith.maximumf %14, %15 : vector<32x128xf32>
    %c30_i32 = arith.constant 30 : i32
    %17 = tpu.dynamic_rotate %16 by %c30_i32 dim 0 : vector<32x128xf32>, i32 -> vector<32x128xf32>
    %18 = arith.maximumf %16, %17 : vector<32x128xf32>
    %c28_i32 = arith.constant 28 : i32
    %19 = tpu.dynamic_rotate %18 by %c28_i32 dim 0 : vector<32x128xf32>, i32 -> vector<32x128xf32>
    %20 = arith.maximumf %18, %19 : vector<32x128xf32>
    %c7_i32_8 = arith.constant 7 : i32
    %21 = tpu.dynamic_rotate %20 by %c7_i32_8 dim 0 : vector<32x128xf32>, i32 -> vector<32x128xf32>
    %22 = arith.maximumf %20, %21 : vector<32x128xf32>
    %23 = vector.extract_strided_slice %6 {offsets = [8, 0], sizes = [16, 128], strides = [1, 1]} : vector<32x128xf32> to vector<16x128xf32>
    %24 = vector.extract_strided_slice %22 {offsets = [8, 0], sizes = [16, 128], strides = [1, 1]} : vector<32x128xf32> to vector<16x128xf32>
    %25 = arith.cmpf oeq, %23, %24 : vector<16x128xf32>
    %cst = arith.constant 9.900000e-01 : f32
    %26 = vector.broadcast %cst : f32 to vector<16x128xf32>
    %27 = arith.cmpf ogt, %23, %26 : vector<16x128xf32>
    %28 = arith.andi %25, %27 : vector<16x128xi1>
    %29 = tpu.iota {dimensions = array<i32: 0>} : vector<16x128xi32>
    %c16_i32 = arith.constant 16 : i32
    %30 = arith.muli %arg1, %c16_i32 : i32
    %31 = vector.broadcast %30 : i32 to vector<16x128xi32>
    %32 = arith.addi %29, %31 : vector<16x128xi32>
    %33 = tpu.iota {dimensions = array<i32: 1>} : vector<16x128xi32>
    %c128_i32 = arith.constant 128 : i32
    %34 = vector.broadcast %c128_i32 : i32 to vector<16x128xi32>
    %35 = arith.muli %32, %34 : vector<16x128xi32>
    %36 = arith.addi %35, %33 : vector<16x128xi32>
    %c2048_i32 = arith.constant 2048 : i32
    %37 = vector.broadcast %c2048_i32 : i32 to vector<16x128xi32>
    %38 = arith.select %28, %36, %37 : vector<16x128xi1>, vector<16x128xi32>
    %c0_9 = arith.constant 0 : index
    %c0_10 = arith.constant 0 : index
    %c0_11 = arith.constant 0 : index
    %39 = vector.load %arg5[%c0_9, %c0_10, %c0_11] : memref<1x16x128xi32, #tpu.memory_space<vmem>>, vector<1x16x128xi32>
    %40 = vector.shape_cast %39 : vector<1x16x128xi32> to vector<16x128xi32>
    %41 = vector.shape_cast %38 : vector<16x128xi32> to vector<1x16x128xi32>
    tpu.vector_store %arg5[%c0_9, %c0_10, %c0_11], %41 {strides = array<i32>} : memref<1x16x128xi32, #tpu.memory_space<vmem>>, vector<1x16x128xi32>,
    return
  }
  func.func @transform_0(%arg0: i32, %arg1: i32) -> (i32, i32, i32) {
    %c1_i32 = arith.constant 1 : i32
    %0 = arith.addi %arg1, %c1_i32 : i32
    %c2_i32 = arith.constant 2 : i32
    %1 = arith.muli %0, %c2_i32 : i32
    %c1_i32_0 = arith.constant 1 : i32
    %2 = arith.subi %1, %c1_i32_0 : i32
    %c0_i32 = arith.constant 0 : i32
    %c0_i32_1 = arith.constant 0 : i32
    return %arg0, %2, %c0_i32 : i32, i32, i32
  }
  func.func @transform_1(%arg0: i32, %arg1: i32) -> (i32, i32, i32) {
    %c1_i32 = arith.constant 1 : i32
    %0 = arith.addi %arg1, %c1_i32 : i32
    %c0_i32 = arith.constant 0 : i32
    %c0_i32_0 = arith.constant 0 : i32
    return %arg0, %0, %c0_i32 : i32, i32, i32
  }
  func.func @transform_2(%arg0: i32, %arg1: i32) -> (i32, i32, i32) {
    %c2_i32 = arith.constant 2 : i32
    %0 = arith.addi %arg1, %c2_i32 : i32
    %c2_i32_0 = arith.constant 2 : i32
    %1 = arith.muli %0, %c2_i32_0 : i32
    %c0_i32 = arith.constant 0 : i32
    %c0_i32_1 = arith.constant 0 : i32
    return %arg0, %1, %c0_i32 : i32, i32, i32
  }
  func.func @transform_3(%arg0: i32, %arg1: i32) -> (i32, i32, i32) {
    %c0_i32 = arith.constant 0 : i32
    %c0_i32_0 = arith.constant 0 : i32
    return %arg0, %arg1, %c0_i32 : i32, i32, i32
  }
}

</mosaic_0001>

<bundles_post_ra>
// kernel: tpu_custom_call.1
= control target key start
LH: loop header
LB: loop body
LE: loop exit
PB: predicated region body
PF: predicated region fallthrough
CT: control target
= control target key end

     0   :  { %s1096_s0 = inlined_call_operand.hbm [shape: f32[2,48,128], index: 0, kind: input, shape index: {}]   ;;  %s1097_s1 = inlined_call_operand.hbm [shape: f32[2,48,128], index: 1, kind: input, shape index: {}]   ;;  %s1098_s2 = inlined_call_operand.hbm [shape: f32[2,48,128], index: 2, kind: input, shape index: {}]   ;;  %s1099_s3 = inlined_call_operand.hbm [shape: s32[2,16,128], index: 3, kind: output, shape index: {}]  }
   0x1   :  { %1105 = sst [smem:[#allocation17_spill]] %s1097_s1 }
   0x2   :  { %8 = vsyncpa [#allocation3], 0 }
   0x3   :  { %10 = vsyncpa [#allocation3 + $0x1], 0 }
   0x4   :  { %11 = vsyncpa [#allocation6], 0 }
   0x5   :  { %13 = vsyncpa [#allocation6 + $0x1], 0 }
   0x6   :  { %14 = vsyncpa [#allocation4], 0 }
   0x7   :  { %16 = vsyncpa [#allocation4 + $0x1], 0  ;;  %s903_s12 = smov 0   ;;  %s905_s13 = smov 0  }
   0x8   :  { %s907_s14 = smov 0   ;;  %s909_s15 = smov 0  }
   0x9   :  { %s911_s16 = smov 0   ;;  %s913_s17 = smov 0  }
   0xa LB: > { %1106 = sst [smem:[#allocation12_spill]] %s861_s14  ;;  %s934_s18 = sadd.s32 4294967295, %s873_s17   ;;  %s873_s17 = sphi %s913_s17, %s22_s17   ;;  %s869_s16 = sphi %s911_s16, %s1122_s16   ;;  %s865_s15 = sphi %s909_s15, %s1121_s15   ;;  %s861_s14 = sphi %s907_s14, %s1120_s14   ;;  %s857_s13 = sphi %s905_s13, %s1124_s13   ;;  %s853_s12 = sphi %s903_s12, %s1123_s12  }
   0xb   : > { %1107 = sst [smem:[#allocation13_spill]] %s869_s16  ;;  %s593_s19 = sadd.s32 4294967294, %s873_s17  }
   0xc   : > { %1108 = sst [smem:[#allocation14_spill]] %s873_s17  ;;  %s34_s20 = sadd.s32 1, %s869_s16 }
   0xd   : > { %s49_s21 = sadd.s32 1, %s861_s14  ;;  %p36_p0 = scmp.ge.s32.totalorder %s34_s20, 2 }
   0xe   : > { %p56_p1 = scmp.ne.s32.totalorder %s861_s14, %s857_s13  ;;  %p57_p2 = scmp.eq.s32.totalorder %s873_s17, 0 }
   0xf   : > { %p62_p3 = scmp.ne.s32.totalorder %s857_s13, %s853_s12  ;;  %s1126_s20 = smov (%p36_p0, %s34_s20), 0 }
  0x10   : > { %1109 = sst [smem:[#allocation15_spill]] %s1126_s20  ;;  %p946_p4 = por %p57_p2, %p56_p1 }
  0x11   : > { %p63_p5 = scmp.eq.s32.totalorder %s934_s18, 0  ;;  %s44_s23 = ssub.s32 %s869_s16, %s1126_s20 }
  0x12   : > { %p150_p6 = scmp.eq.s32.totalorder %s934_s18, 1  ;;  %p47_p7 = scmp.eq.s32.totalorder %s44_s23, 0 }
  0x13   : > { %p954_p8 = por %p63_p5, %p62_p3  ;;  %p156_p10 = scmp.eq.s32.totalorder %s593_s19, 1 }
  0x14   : > { %p958_p9 = por %p150_p6, %p56_p1  ;;  %p595_p12 = scmp.ge.s32.totalorder %s873_s17, 2 }
  0x15   : > { %s963_s26 = scalar_select %p47_p7, %s861_s14, %s49_s21  }
  0x16   : > { %p965_p11 = por %p156_p10, %p62_p3  ;;  %p638_p13 = scmp.lt.s32.totalorder %s873_s17, 2 }
  0x17   : > { %1113 = sst [smem:[#allocation16_spill]] %s963_s26  ;;  %s972_s28 = sand.u32 1, %s861_s14  }
  0x18   : > { %s200_s29 = sand.u32 1, %s873_s17   ;;  %s639_s30 = smul.u32 48, %s869_s16 }
  0x19   : > { %p978_p0 = pnand %p638_p13, %p946_p4  ;;  %s598_s5 = sshll.u32 %s972_s28, 4 }
  0x1a   : > { %s1116_s1 = sld [smem:[#allocation17_spill]]  ;;  %s204_s9 = scalar_lea.vmem [#allocation5], %s598_s5 }
  0x1b   : > { %s215_s10 = sshll.u32 %s204_s9, 4  ;;  %s201_s21 = scalar_lea.sflag [#allocation6], %s200_s29  ;;  %s216_s10 = int_to_ptr.vmem [resolvable:$true] %s215_s10 }
  0x1c   : > { %s875_s22 = smov 128   ;;  %s876_s23 = smov 8  }
  0x1d   : > { %p602_p1 = scmp.ge.s32.totalorder %s873_s17, 1  ;;  %p246_p2 = scmp.lt.s32.totalorder %s873_s17, 3 }
  0x1e   : > { %s596_s6 = sshll.u32 %s972_s28, 3  ;;  %s613_s5 = sadd.s32 8, %s639_s30 }
  0x1f   : > { %p990_p3 = pnand %p602_p1, %p246_p2  ;;  %s189_s9 = scalar_lea.hbm %s1096_s0, %s613_s5 }
  0x20   : > { %s499_s8 = scalar_lea.hbm %s1116_s1, %s639_s30  ;;  %s180_s29 = scalar_lea.vmem [#allocation2], %s596_s6 }
  0x21   : > { %s500_s11 = scalar_lea.hbm %s499_s8, 16  ;;  %s193_s1 = sshll.u32 %s180_s29, 4  ;;  %s194_s1 = int_to_ptr.vmem [resolvable:$true] %s193_s1 }
  0x22   : > { %s213_s19 = sshll.u32 %s500_s11, 4  ;;  %s191_s11 = sshll.u32 %s189_s9, 4  ;;  %s214_s19 = int_to_ptr.hbm [resolvable:$true] %s213_s19  ;;  %s192_s11 = int_to_ptr.hbm [resolvable:$true] %s191_s11 }
  0x23   : > { %630 = dma.hbm_to_vmem [thread:$0]  (!%p978_p0), %s214_s19, 256, %s216_s10, %s201_s21, %s875_s22, %s875_s22, %s876_s23  }
  0x24   : > { %s177_s16 = scalar_lea.sflag [#allocation3], %s972_s28  ;;  %s508_s22 = scalar_lea.hbm %s1098_s2, %s639_s30 }
  0x25   : > { %627 = dma.hbm_to_vmem [thread:$0]  (!%p978_p0), %s192_s11, 128, %s194_s1, %s177_s16  }
  0x26   : > { %s509_s23 = scalar_lea.hbm %s508_s22, 32  ;;  %s229_s26 = scalar_lea.vmem [#allocation7], %s596_s6 }
  0x27   : > { %s241_s14 = sshll.u32 %s229_s26, 4  ;;  %s239_s17 = sshll.u32 %s509_s23, 4  ;;  %s242_s14 = int_to_ptr.vmem [resolvable:$true] %s241_s14  ;;  %s240_s17 = int_to_ptr.hbm [resolvable:$true] %s239_s17 }
  0x28   : > { %633 = dma.hbm_to_vmem [thread:$0]  (!%p978_p0), %s240_s17, 128, %s242_s14, %s201_s21  }
  0x29   : > { %250 = sbr.rel (%p990_p3) target bundleno = 532 (0x214), region = 32  ;;  %s1009_s28 = sand.u32 (!%p990_p3), 1, %s857_s13  }
  0x2a   : > { %s603_s1 = sshll.u32 (!%p990_p3), %s1009_s28, 3  ;;  %s253_s16 = scalar_lea.sflag (!%p990_p3), [#allocation3], %s1009_s28 }
  0x2b   : > { %s256_s30 = scalar_lea.vmem (!%p990_p3), [#allocation2], %s603_s1 }
  0x2e   : > { %840 = dma.done.wait (%p954_p8), %s253_s16, 128  }
  0x2f   : > { %842 = vsyncadd (%p954_p8), %s253_s16, 4294967168  ;;  %s262_s14 = sand.u32 1, %s934_s18   ;;  %s604_s17 = sshll.u32 %s1009_s28, 4 }
  0x30   : > { %s263_s20 = scalar_lea.sflag [#allocation6], %s262_s14  ;;  %s266_s26 = scalar_lea.vmem [#allocation5], %s604_s17 }
  0x31   : > { %844 = dma.done.wait (%p954_p8), %s263_s20, 384  }
  0x32   : > { %846 = vsyncadd (%p954_p8), %s263_s20, 4294966912  ;;  %v1025_v0 = vld [vmem:[%s266_s26 + $0x8] sm:$0xff]  ;;  %s877_s4 = smov 127   ;;  %s276_s21 = scalar_lea.vmem [#allocation7], %s603_s1  ;;  %v1028_v3 = vld [vmem:[%s266_s26] sm:$0xff]  ;;  %v374_v29 = vlaneseq }
  0x33   : > { %v318_v1 = vld [vmem:[%s256_s30] sm:$0xff]  ;;  %326 = vrot.lane.b32.xlu1 %v1025_v0, %s877_s4  ;;  %v321_v2 = vld [vmem:[%s276_s21] sm:$0xff]  ;;  %s878_s18 = smov 126   ;;  %s879_s24 = smov 124   ;;  %vm419_vm3 = vcmp.gt.f32.partialorder %v1025_v0, 0.99 }
  0x34   : > { %322 = vrot.lane.b32.xlu0 %v318_v1, %s877_s4  ;;  %s880_s6 = smov 7   ;;  %v1033_v31 = vshrl.u32 %v374_v29, 7  ;;  %s614_s5 = sshll.u32 %s865_s15, 4  ;;  %vm418_vm4 = vcmp.gt.f32.partialorder %v1028_v3, 0.99 }
  0x35   : > { %s451_s9 = scalar_lea.hbm %s1099_s3, %s614_s5  ;;  %s309_s15 = scalar_lea.vmem [#allocation8], %s604_s17 }
  0x36   : > { %vm376_vm0 = vcmp.lt.s32.totalorder %v1033_v31, 7  ;;  %vm389_vm1 = vcmp.lt.s32.totalorder %v1033_v31, 6  ;;  %vm402_vm2 = vcmp.lt.s32.totalorder %v1033_v31, 4  ;;  %v422_v62 = vadd.s32 8, %v1033_v31  ;;  %s452_s11 = sshll.u32 %s309_s15, 4  ;;  %s454_s29 = sshll.u32 %s451_s9, 4  ;;  %s453_s11 = int_to_ptr.vmem [resolvable:$true] %s452_s11  ;;  %s455_s29 = int_to_ptr.hbm [resolvable:$true] %s454_s29 }
  0x37   : > { %s438_s10 = scalar_lea.sflag [#allocation4], %s1009_s28  ;;  %s801_s19 = sshra.s32 %s455_s29, 4  ;;  %s802_s19 = int_to_ptr.hbm [resolvable:$true] %s801_s19 }
  0x38   : > { %s803_s22 = scalar_lea.hbm %s802_s19, 16  ;;  %s807_s16 = scalar_lea.hbm %s1099_s3, 32 }
  0x39   : > { %p804_p4 = scmp.ne.s32.totalorder %s802_s19, %s803_s22  ;;  %p808_p7 = scmp.lt.s32.totalorder %s802_s19, %s1099_s3 }
  0x3a   : > { %p809_p8 = scmp.lt.s32.totalorder %s807_s16, %s803_s22 }
  0x3b   : > { %328 = vrot.lane.b32.xlu1 %v321_v2, %s877_s4  ;;  %p805_p5 = pnand %p804_p4, %p958_p9 }
  0x3c   : > { %324 = vrot.lane.b32.xlu0 %v1028_v3, %s877_s4  ;;  %p810_p10 = por %p809_p8, %p808_p7 }
  0x3d   : > { %p806_p6 = pneg %p805_p5 }
  0x3f   : > { %p811_p13 = pnand %p810_p10, %p806_p6 }
  0xa5   : > { %v327_v4 = vpop.permute.xlu1 %326 }
  0xa6   : > { %v323_v5 = vpop.permute.xlu0 %322  ;;  %v332_v6 = vmax.f32 %v1025_v0, %v327_v4 }
  0xa7   : > { %v330_v7 = vmax.f32 %v318_v1, %v323_v5 }
  0xa8   : > { %338 = vrot.lane.b32.xlu0 %v332_v6, %s878_s18 }
  0xa9   : > { %334 = vrot.lane.b32.xlu2 %v330_v7, %s878_s18 }
  0xad   : > { %v329_v8 = vpop.permute.xlu1 %328 }
  0xae   : > { %v325_v9 = vpop.permute.xlu0 %324  ;;  %v333_v10 = vmax.f32 %v321_v2, %v329_v8 }
  0xaf   : > { %v331_v11 = vmax.f32 %v1028_v3, %v325_v9 }
  0xb0   : > { %340 = vrot.lane.b32.xlu1 %v333_v10, %s878_s18 }
  0xb1   : > { %336 = vrot.lane.b32.xlu2 %v331_v11, %s878_s18 }
 0x103   : > { %v335_v12 = vpop.permute.xlu2 %334 }
 0x104   : > { %v342_v13 = vmax.f32 %v330_v7, %v335_v12  ;;  %v430_v12 = vmul.u32 128, %v422_v62 }
 0x106   : > { %346 = vrot.lane.b32.xlu2 %v342_v13, %s879_s24 }
 0x10b   : > { %v337_v14 = vpop.permute.xlu2 %336 }
 0x10c   : > { %v343_v15 = vmax.f32 %v331_v11, %v337_v14  ;;  %v428_v11 = vand.u32 127, %v374_v29 }
 0x10e   : > { %348 = vrot.lane.b32.xlu0 %v343_v15, %s879_s24 }
 0x11a   : > { %v339_v16 = vpop.permute.xlu0 %338 }
 0x11b   : > { %v344_v17 = vmax.f32 %v332_v6, %v339_v16  ;;  %v429_v16 = vmul.u32 128, %v1033_v31 }
 0x11d   : > { %350 = vrot.lane.b32.xlu1 %v344_v17, %s879_s24 }
 0x122   : > { %v341_v18 = vpop.permute.xlu1 %340 }
 0x123   : > { %v345_v19 = vmax.f32 %v333_v10, %v341_v18 }
 0x125   : > { %352 = vrot.lane.b32.xlu2 %v345_v19, %s879_s24 }
 0x160   : > { %v347_v20 = vpop.permute.xlu2 %346 }
 0x161   : > { %v354_v21 = vmax.f32 %v342_v13, %v347_v20 }
 0x163   : > { %358 = vrot.lane.b32.xlu0 %v354_v21, %s880_s6 }
 0x17f   : > { %v353_v22 = vpop.permute.xlu2 %352 }
 0x180   : > { %v349_v23 = vpop.permute.xlu0 %348  ;;  %v357_v24 = vmax.f32 %v345_v19, %v353_v22  ;;  %v432_v19 = vadd.s32 %v430_v12, %v428_v11  ;;  %v431_v22 = vadd.s32 %v429_v16, %v428_v11 }
 0x181   : > { %v355_v25 = vmax.f32 %v343_v15, %v349_v23 }
 0x182   : > { %364 = vrot.lane.b32.xlu0 %v357_v24, %s880_s6 }
 0x183   : > { %360 = vrot.lane.b32.xlu1 %v355_v25, %s880_s6 }
 0x18f   : > { %v351_v26 = vpop.permute.xlu1 %350 }
 0x190   : > { %v356_v27 = vmax.f32 %v344_v17, %v351_v26 }
 0x192   : > { %362 = vrot.lane.b32.xlu2 %v356_v27, %s880_s6 }
 0x1d5   : > { %v359_v28 = vpop.permute.xlu0 %358 }
 0x1d6   : > { %v366_v32 = vmax.f32 %v354_v21, %v359_v28 }
 0x1d8   : > { %v370_v38 = vrot.slane %v366_v32, 1 }
 0x1ec   : > { %v363_v30 = vpop.permute.xlu2 %362 }
 0x1ed   : > { %v368_v33 = vmax.f32 %v356_v27, %v363_v30 }
 0x1ef   : > { %v372_v39 = vrot.slane %v368_v33, 1 }
 0x1f4   : > { %v365_v35 = vpop.permute.xlu0 %364 }
 0x1f5   : > { %v361_v34 = vpop.permute.xlu1 %360  ;;  %v369_v37 = vmax.f32 %v357_v24, %v365_v35 }
 0x1f6   : > { %v367_v36 = vmax.f32 %v355_v25, %v361_v34 }
 0x1f7   : > { %v373_v41 = vrot.slane %v369_v37, 1 }
 0x1f8   : > { %v371_v40 = vrot.slane %v367_v36, 1 }
 0x1f9   : > { %v377_v44 = vsel %vm376_vm0, %v372_v39, %v373_v41  ;;  %v380_v45 = vsel %vm376_vm0, %v373_v41, %v370_v38 }
 0x1fa   : > { %v378_v42 = vsel %vm376_vm0, %v371_v40, %v372_v39  ;;  %v379_v43 = vsel %vm376_vm0, %v370_v38, %v371_v40  ;;  %v383_v48 = vmax.f32 %v368_v33, %v377_v44  ;;  %v384_v49 = vmax.f32 %v369_v37, %v380_v45 }
 0x1fb   : > { %v381_v46 = vmax.f32 %v366_v32, %v379_v43  ;;  %v382_v47 = vmax.f32 %v367_v36, %v378_v42 }
 0x1fc   : > { %v387_v52 = vrot.slane %v383_v48, 2  ;;  %v388_v53 = vrot.slane %v384_v49, 2 }
 0x1fd   : > { %v385_v50 = vrot.slane %v381_v46, 2  ;;  %v386_v51 = vrot.slane %v382_v47, 2 }
 0x1fe   : > { %v390_v55 = vsel %vm389_vm1, %v387_v52, %v388_v53 }
 0x1ff   : > { %v392_v54 = vsel %vm389_vm1, %v385_v50, %v386_v51  ;;  %v391_v56 = vsel %vm389_vm1, %v386_v51, %v387_v52  ;;  %v393_v57 = vsel %vm389_vm1, %v388_v53, %v385_v50  ;;  %v396_v60 = vmax.f32 %v383_v48, %v390_v55 }
 0x200   : > { %v394_v58 = vmax.f32 %v381_v46, %v392_v54  ;;  %v395_v59 = vmax.f32 %v382_v47, %v391_v56  ;;  %v397_v61 = vmax.f32 %v384_v49, %v393_v57 }
 0x201   : > { %v400_v2 = vrot.slane %v396_v60, 4 }
 0x202   : > { %v398_v63 = vrot.slane %v394_v58, 4  ;;  %v399_v1 = vrot.slane %v395_v59, 4  ;;  %v401_v4 = vrot.slane %v397_v61, 4 }
 0x204   : > { %v403_v5 = vsel %vm402_vm2, %v400_v2, %v401_v4  ;;  %v404_v6 = vsel %vm402_vm2, %v399_v1, %v400_v2  ;;  %v405_v7 = vsel %vm402_vm2, %v398_v63, %v399_v1 }
 0x205   : > { %v406_v8 = vmax.f32 %v394_v58, %v405_v7  ;;  %v407_v9 = vmax.f32 %v395_v59, %v404_v6  ;;  %v408_v10 = vmax.f32 %v396_v60, %v403_v5 }
 0x207   : > { %v409_v13 = vrot.slane %v406_v8, 1  ;;  %v410_v14 = vrot.slane %v407_v9, 1  ;;  %v411_v15 = vrot.slane %v408_v10, 1 }
 0x209   : > { %v412_v17 = vsel %vm376_vm0, %v410_v14, %v411_v15  ;;  %v413_v18 = vsel %vm376_vm0, %v409_v13, %v410_v14 }
 0x20a   : > { %v414_v20 = vmax.f32 %v407_v9, %v413_v18  ;;  %v415_v21 = vmax.f32 %v408_v10, %v412_v17 }
 0x20c   : > { %vm416_vm5 = vcmp.eq.f32.partialorder %v1028_v3, %v414_v20  ;;  %vm417_vm6 = vcmp.eq.f32.partialorder %v1025_v0, %v415_v21 }
 0x20d   : > { %vm421_vm7 = vmand %vm417_vm6, %vm419_vm3 }
 0x20e   : > { %v434_v23 = vsel %vm421_vm7, %v432_v19, 2048  ;;  %vm420_vm8 = vmand %vm416_vm5, %vm418_vm4 }
 0x20f   : > { %v433_v24 = vsel %vm420_vm8, %v431_v22, 2048  ;;  %436 = vst [vmem:[%s309_s15 + $0x8] sm:$0xff] %v434_v23 }
 0x210   : > { %435 = vst [vmem:[%s309_s15] sm:$0xff] %v433_v24 }
 0x211   : > { %814 = shalt.err (!%p811_p13)
}
 0x212   : > { %s881_s28 = smov 128   ;;  %s882_s17 = smov 8  }
 0x213   : > { %622 = dma.vmem_to_hbm [thread:$0]  (%p958_p9), %s453_s11, 256, %s455_s29, %s438_s10, %s881_s28, %s881_s28, %s882_s17  }
 0x214 PF: > { %s1118_s20 = sld [smem:[#allocation14_spill]]  ;;  %s469_s26 = sand.u32 1, %s853_s12  }
 0x215   : > { %p635_p0 = pnand %p595_p12, %p965_p11  ;;  %s470_s4 = scalar_lea.sflag [#allocation4], %s469_s26 }
 0x217   : > { %p636_p1 = pneg %p635_p0 }
 0x219   : > { %848 = dma.done.wait (%p636_p1), %s470_s4, 256  }
 0x21a   : > { %850 = vsyncadd (%p636_p1), %s470_s4, 4294967040  ;;  %s22_s17 = sadd.s32 1, %s1118_s20   ;;  %s1119_s21 = sld [smem:[#allocation12_spill]] }
 0x21b   : > { %p19_p2 = scmp.ge.s32.totalorder %s22_s17, 4   ;;  %s1120_s14 = sld [smem:[#allocation16_spill]] }
 0x21c   : > { %s1121_s15 = sld [smem:[#allocation13_spill]]  ;;  %s1123_s12 = smov %s857_s13 }
 0x21d   : > { %s1122_s16 = sld [smem:[#allocation15_spill]]  ;;  %21 = sbr.rel (!%p19_p2) target bundleno = 10 (0xa), region = 101 }
 0x220   : > { %s1124_s13 = smov %s1119_s21 }
 0x222   :  { %476 = vsyncpa [#allocation3], 1 }
 0x223   :  { %478 = vsyncpa [#allocation3 + $0x1], 1 }
 0x224   :  { %479 = vsyncpa [#allocation6], 1 }
 0x225   :  { %481 = vsyncpa [#allocation6 + $0x1], 1 }
 0x226   :  { %482 = vsyncpa [#allocation4], 1 }
 0x227   :  { %484 = vsyncpa [#allocation4 + $0x1], 1 }

</bundles_post_ra>
